<compile_context>
chip_gen: v5e
topology: v5e:2x2
jax: 0.10.0
libtpu: 0.0.40
codegen_flags: <defaults>
</compile_context>

<pallas_src>
import functools

import jax
import jax.numpy as jnp
from jax.experimental import pallas as pl
from jax.experimental.pallas import tpu as pltpu


# Sublane packing per element size: f32 -> 8, bf16/f16 -> 16, int8/fp8 -> 32.
_SUBLANE_ALIGN = {1: 32, 2: 16, 4: 8, 8: 8}


def _token_mean_kernel(x_ref, o_ref, acc_ref, *, inv_n, n_tokens, tn, mask_tail):
    """Accumulate token sums of a (tb, tn, Cf) tile into an f32 (tb, Cf) scratch.

    Grid axis 0 = batch blocks ("parallel"), axis 1 = token reduction ("arbitrary").
    At the last reduction step the accumulator is scaled by 1/N (true N) and
    written in o_ref's dtype.
    """
    k = pl.program_id(1)

    @pl.when(k == 0)
    def _():
        acc_ref[...] = jnp.zeros_like(acc_ref)

    x = x_ref[...]
    if mask_tail:
        # Zero token rows past the true (folded) sequence length.  Only the last
        # reduction tile is partial; for full tiles the mask is all-true and the
        # extra VPU work is free filler in this HBM-bound kernel.
        tok = jax.lax.broadcasted_iota(jnp.int32, x.shape, 1)
        valid = tok < (n_tokens - k * tn)
        x = jnp.where(valid, x, jnp.zeros_like(x))

    # Partial token-sum accumulated in f32 (matches torch.mean numerics, avoids
    # materializing an f32 copy of the whole tile for low-precision inputs).
    acc_ref[...] += jnp.sum(x, axis=1, dtype=jnp.float32)

    @pl.when(k == pl.num_programs(1) - 1)
    def _():
        o_ref[...] = (acc_ref[...] * inv_n).astype(o_ref.dtype)


def _vmem_capacity_bytes() -> int:
    """Physical VMEM per core, with a conservative (v7x-sized) fallback."""
    try:
        info = pltpu.get_tpu_info()
        cap = getattr(info, "vmem_capacity_bytes", None)
        if cap is not None and int(cap) > 0:
            return int(cap)
    except Exception:
        pass
    return 64 * 1024 * 1024  # assume the smallest (v7x per-TC) if unknown


def _round_down(x: int, m: int) -> int:
    return (x // m) * m


def token_mean(x: jax.Array,
               *,
               target_tile_bytes: int | None = None,
               vmem_limit_bytes: int | None = None,
               fast_path_bytes: int = 4 * 1024 * 1024) -> jax.Array:
    """mean over axis 1 of a (B, N, C) array, computed in a Pallas TPU kernel."""
    B, N, C = x.shape
    if N == 0:
        # torch.mean over an empty dim yields NaN.
        return jnp.full((B, C), jnp.nan, dtype=x.dtype)

    itemsize = jnp.dtype(x.dtype).itemsize
    align = _SUBLANE_ALIGN.get(itemsize, 8)

    # ---- Lane-dense folding for narrow channel dims (C < 128, 128 % C == 0). ----
    # (B, N, C) -> (B, N//f, f*C) is a pure row-major reinterpretation (free
    # bitcast reshape); the f channel sub-groups are re-added in the wrapper.
    fold = 1
    if C < 128 and 128 % C == 0 and N % (128 // C) == 0:
        fold = 128 // C
    Nf, Cf = N // fold, C * fold
    xf = x.reshape(B, Nf, Cf) if fold > 1 else x
    # TODO(synk): for C not a divisor/multiple of 128, add a lane-aligned C grid
    # axis instead of passing the ragged C dim as a full-extent (lane-sparse) block.

    # ---- Generation-aware DMA tile target + scoped VMEM limit. ----
    vmem_cap = _vmem_capacity_bytes()
    is_small_vmem = vmem_cap <= 96 * 1024 * 1024  # v7x-class (64 MiB physical / TC)
    if target_tile_bytes is None:
        # v7x: fastest HBM -> biggest tiles pay off most; still 2x tile + slack < 64 MiB.
        target_tile_bytes = (14 if is_small_vmem else 8) * 1024 * 1024
    if vmem_limit_bytes is None:
        vmem_limit_bytes = (46 if is_small_vmem else 32) * 1024 * 1024

    total_bytes = B * Nf * Cf * itemsize

    if total_bytes <= fast_path_bytes:
        # Small-input fast path: one grid step, full-array blocks (grid-step and
        # pipeline-prologue overhead dominates at these sizes).
        tb, tn = B, Nf
    else:
        # Batch tile: multiples of 8 keep the (tb, Cf) output block sublane-legal
        # and give >=2 batch blocks (both v7x TensorCores) whenever B > 8.
        tb = 8 if B > 8 else B
        # TODO(synk): for B <= 8 on v7x, add a leading parallel axis that splits N
        # in two (partial (2, B, Cf) sums combined in the wrapper) so both TCs run.
        # Token tile sized so one (tb, tn, Cf) input tile hits the DMA byte target.
        tn_target = max(align, target_tile_bytes // max(1, tb * Cf * itemsize))
        tn = max(align, _round_down(tn_target, align))
        if tn >= Nf:
            tn = Nf

    grid = (pl.cdiv(B, tb), pl.cdiv(Nf, tn))
    mask_tail = (Nf % tn) != 0

    out_dtype = jnp.float32 if fold > 1 else x.dtype
    kernel = functools.partial(
        _token_mean_kernel,
        inv_n=float(1.0 / N),  # divide by the TRUE sequence length
        n_tokens=Nf,
        tn=tn,
        mask_tail=mask_tail,
    )

    cost = pl.CostEstimate(
        flops=B * Nf * Cf,
        transcendentals=0,
        bytes_accessed=total_bytes + B * Cf * jnp.dtype(out_dtype).itemsize,
    )

    sums = pl.pallas_call(
        kernel,
        out_shape=jax.ShapeDtypeStruct((B, Cf), out_dtype),
        grid_spec=pltpu.PrefetchScalarGridSpec(
            num_scalar_prefetch=0,
            grid=grid,
            # TODO(synk): sweep pipeline_mode=pl.Buffered(3) on v7x if a trace
            # shows exposed DMA after tile-size tuning.
            in_specs=[pl.BlockSpec((tb, tn, Cf), lambda b, k: (b, k, 0))],
            out_specs=pl.BlockSpec((tb, Cf), lambda b, k: (b, 0)),
            scratch_shapes=[pltpu.VMEM((tb, Cf), jnp.float32)],
        ),
        compiler_params=pltpu.CompilerParams(
            dimension_semantics=("parallel", "arbitrary"),
            vmem_limit_bytes=int(vmem_limit_bytes),
        ),
        cost_estimate=cost,
    )(xf)

    if fold > 1:
        # Re-add the f channel sub-groups (each already scaled by 1/N) in f32.
        sums = jnp.sum(sums.reshape(B, fold, C), axis=1)
    return sums.astype(x.dtype)


class MetaFormerEncoder:
    """Matches the PyTorch MetaFormerEncoder: blocks = Identity."""

    def __call__(self, x):
        return x  # nn.Identity()


class MetaFormer:
    """JAX/Pallas re-implementation of the PyTorch MetaFormer backbone."""

    def __init__(self, hidden_sizes):
        self._feature_dim = hidden_sizes[-1]
        self._intermediate_features_dim = hidden_sizes
        self.patch_embed = lambda x: x  # nn.Identity()
        self.encoder = MetaFormerEncoder()
        self.norm = lambda x: x  # nn.Identity()

    @property
    def feature_dim(self):
        return self._feature_dim

    @property
    def intermediate_features_dim(self):
        return self._intermediate_features_dim

    def __call__(self, x):
        x = self.patch_embed(x)
        x = self.encoder(x)
        x = self.norm(x)
        feat = token_mean(x)  # torch.mean(x, dim=1) in the Pallas kernel
        return {"last_feature": feat}  # BackboneOutput(last_feature=feat)


if __name__ == "__main__":
    key = jax.random.PRNGKey(0)
    k1, k2, k3 = jax.random.split(key, 3)

    # Case 1: small token-layout input through the full module.
    # (B, N, C) = (2, 8, 32): exercises the lane-dense fold (32 -> 128 lanes)
    # and the single-step fast path.
    hidden_sizes = [16, 24, 32]
    B1, N1, C1 = 2, 8, hidden_sizes[-1]
    x1 = jax.random.normal(k1, (B1, N1, C1), dtype=jnp.float32)
    model = MetaFormer(hidden_sizes)
    feat1 = jax.block_until_ready(model(x1)["last_feature"])
    ref1 = jnp.mean(x1, axis=1)
    assert feat1.shape == (B1, C1)
    assert jnp.allclose(feat1, ref1, atol=1e-5, rtol=1e-5)

    # Case 2: force the tiled path (tiny tile target, fast path disabled) to
    # exercise the cdiv grid, the masked token tail (200 % 16 != 0) and a
    # partial trailing batch block (10 % 8 != 0).
    B2, N2, C2 = 10, 200, 128
    x2 = jax.random.normal(k2, (B2, N2, C2), dtype=jnp.float32)
    feat2 = jax.block_until_ready(
        token_mean(x2, target_tile_bytes=64 * 1024, fast_path_bytes=0))
    ref2 = jnp.mean(x2, axis=1)
    assert feat2.shape == (B2, C2)
    assert jnp.allclose(feat2, ref2, atol=1e-5, rtol=1e-5)

    # Case 3: bf16 input (sublane alignment 16, fold factor 2) through the module.
    B3, N3, C3 = 4, 64, 64
    x3 = jax.random.normal(k3, (B3, N3, C3), dtype=jnp.float32).astype(jnp.bfloat16)
    model3 = MetaFormer([C3])
    feat3 = jax.block_until_ready(model3(x3)["last_feature"])
    ref3 = jnp.mean(x3.astype(jnp.float32), axis=1)
    assert feat3.shape == (B3, C3)
    assert jnp.allclose(feat3.astype(jnp.float32), ref3, atol=5e-3, rtol=5e-2)

    print("KERNEL_OK")
</pallas_src>

<mosaic_0001>
module attributes {stable_mosaic.version = 11 : i64} {
  func.func @_token_mean_kernel(%arg0: i32, %arg1: i32, %arg2: memref<2x2x128xf32, #tpu.memory_space<vmem>>, %arg3: memref<2x128xf32, #tpu.memory_space<vmem>>, %arg4: memref<2x128xf32, #tpu.memory_space<vmem>>) attributes {dimension_semantics = [#tpu.dimension_semantics<parallel>, #tpu.dimension_semantics<arbitrary>], iteration_bounds = array<i64: 1, 1>, scalar_prefetch = 0 : i64, scratch_operands = 1 : i64, tpu.core_type = #tpu.core_type<tc>, window_params = [{transform_indices = @transform_0, window_bounds = array<i64: 2, 2, 128>}, {transform_indices = @transform_1, window_bounds = array<i64: 2, 128>}]} {
    %c0_i32 = arith.constant 0 : i32
    %0 = arith.cmpi eq, %arg1, %c0_i32 : i32
    %1 = arith.extui %0 : i1 to i32
    %c0_i32_0 = arith.constant 0 : i32
    %2 = arith.cmpi ne, %1, %c0_i32_0 : i32
    scf.if %2 {
      %cst_9 = arith.constant 0.000000e+00 : f32
      %11 = vector.broadcast %cst_9 : f32 to vector<2x128xf32>
      %c0_10 = arith.constant 0 : index
      %c0_11 = arith.constant 0 : index
      %12 = vector.load %arg4[%c0_10, %c0_11] : memref<2x128xf32, #tpu.memory_space<vmem>>, vector<2x128xf32>
      tpu.vector_store %arg4[%c0_10, %c0_11], %11 {strides = array<i32>} : memref<2x128xf32, #tpu.memory_space<vmem>>, vector<2x128xf32>,
    } else {
    }
    %c0 = arith.constant 0 : index
    %c0_1 = arith.constant 0 : index
    %c0_2 = arith.constant 0 : index
    %3 = vector.load %arg2[%c0, %c0_1, %c0_2] : memref<2x2x128xf32, #tpu.memory_space<vmem>>, vector<2x2x128xf32>
    %c0_3 = arith.constant 0 : index
    %c0_4 = arith.constant 0 : index
    %4 = vector.load %arg4[%c0_3, %c0_4] : memref<2x128xf32, #tpu.memory_space<vmem>>, vector<2x128xf32>
    %cst = arith.constant dense<0.000000e+00> : vector<2x128xf32>
    %5 = vector.multi_reduction <add>, %3, %cst [1] : vector<2x2x128xf32> to vector<2x128xf32>
    %6 = arith.addf %4, %5 : vector<2x128xf32>
    %c0_5 = arith.constant 0 : index
    %c0_6 = arith.constant 0 : index
    %7 = vector.load %arg4[%c0_5, %c0_6] : memref<2x128xf32, #tpu.memory_space<vmem>>, vector<2x128xf32>
    tpu.vector_store %arg4[%c0_5, %c0_6], %6 {strides = array<i32>} : memref<2x128xf32, #tpu.memory_space<vmem>>, vector<2x128xf32>,
    %c0_i32_7 = arith.constant 0 : i32
    %8 = arith.cmpi eq, %arg1, %c0_i32_7 : i32
    %9 = arith.extui %8 : i1 to i32
    %c0_i32_8 = arith.constant 0 : i32
    %10 = arith.cmpi ne, %9, %c0_i32_8 : i32
    scf.if %10 {
      %c0_9 = arith.constant 0 : index
      %c0_10 = arith.constant 0 : index
      %11 = vector.load %arg4[%c0_9, %c0_10] : memref<2x128xf32, #tpu.memory_space<vmem>>, vector<2x128xf32>
      %cst_11 = arith.constant 1.250000e-01 : f32
      %12 = vector.broadcast %cst_11 : f32 to vector<2x128xf32>
      %13 = arith.mulf %11, %12 : vector<2x128xf32>
      %c0_12 = arith.constant 0 : index
      %c0_13 = arith.constant 0 : index
      %14 = vector.load %arg3[%c0_12, %c0_13] : memref<2x128xf32, #tpu.memory_space<vmem>>, vector<2x128xf32>
      tpu.vector_store %arg3[%c0_12, %c0_13], %13 {strides = array<i32>} : memref<2x128xf32, #tpu.memory_space<vmem>>, vector<2x128xf32>,
    } else {
    }
    return
  }
  func.func @transform_0(%arg0: i32, %arg1: i32) -> (i32, i32, i32) {
    %c0_i32 = arith.constant 0 : i32
    %c0_i32_0 = arith.constant 0 : i32
    return %arg0, %arg1, %c0_i32 : i32, i32, i32
  }
  func.func @transform_1(%arg0: i32, %arg1: i32) -> (i32, i32) {
    %c0_i32 = arith.constant 0 : i32
    %c0_i32_0 = arith.constant 0 : i32
    return %arg0, %c0_i32 : i32, i32
  }
}

</mosaic_0001>

<bundles_post_ra>
// kernel: tpu_custom_call.1
= control target key start
LH: loop header
LB: loop body
LE: loop exit
PB: predicated region body
PF: predicated region fallthrough
CT: control target
= control target key end

     0   :  { %6 = vsyncpa [#allocation4], 0  ;;  %s156_s0 = inlined_call_operand.hbm [shape: f32[2,2,128], index: 0, kind: input, shape index: {}]   ;;  %s157_s1 = inlined_call_operand.hbm [shape: f32[2,128], index: 1, kind: output, shape index: {}]  }
   0x1   :  { %7 = vsyncpa [#allocation5], 0  ;;  %s12_s8 = sshll.u32 %s156_s0, 4  ;;  %s135_s9 = smov [#allocation3]   ;;  %s13_s8 = int_to_ptr.hbm [resolvable:$true] %s12_s8 }
   0x2   :  { %s14_s10 = sshll.u32 %s135_s9, 4  ;;  %s136_s11 = smov 32   ;;  %s15_s10 = int_to_ptr.vmem [resolvable:$true] %s14_s10 }
   0x3   :  { %s137_s12 = smov 2  }
   0x4   :  { %20 = dma.hbm_to_vmem [thread:$0]  %s13_s8, 64, %s15_s10, [#allocation4], %s136_s11, %s136_s11, %s137_s12  }
   0x5   :  { %131 = dma.done.wait [#allocation4], 64  }
   0x6   :  { %132 = vsyncadd [#allocation4], 4294967232  ;;  %v138_v0 = vmov 0.0   ;;  %vm33_vm0 = vcmask 1041408   ;;  %v30_v1 = vld [vmem:[#allocation3] sm:$0x3] }
   0x7   :  { %29 = vst [vmem:[#allocation2] sm:$0x3] %v138_v0  ;;  %v31_v2 = vld [vmem:[#allocation3 + $0x2] sm:$0x3]  ;;  %v34_v3 = vsel %vm33_vm0, %v30_v1, 0.0  ;;  %vm50_vm1 = vcmask 1041409  }
   0x8   :  { %v41_v4 = vsel %vm33_vm0, %v31_v2, 0.0  ;;  %v35_v5 = vrot.slane %v34_v3, 4  ;;  %s139_s0 = smov [#allocation6]   ;;  %s68_s16 = sshll.u32 %s157_s1, 4  ;;  %s69_s16 = int_to_ptr.hbm [resolvable:$true] %s68_s16 }
   0x9   :  { %v42_v6 = vrot.slane %v41_v4, 4  ;;  %s66_s13 = sshll.u32 %s139_s0, 4  ;;  %s67_s13 = int_to_ptr.vmem [resolvable:$true] %s66_s13 }
   0xa   :  { %v36_v7 = vadd.f32 %v35_v5, %v34_v3 }
   0xb   :  { %v43_v8 = vadd.f32 %v42_v6, %v41_v4 }
   0xc   :  { %v37_v9 = vrot.slane %v36_v7, 2 }
   0xd   :  { %v44_v10 = vrot.slane %v43_v8, 2 }
   0xe   :  { %v38_v11 = vadd.f32 %v37_v9, %v36_v7  ;;  %v32_v15 = vld [vmem:[#allocation2] sm:$0x3] }
   0xf   :  { %v45_v12 = vadd.f32 %v44_v10, %v43_v8 }
  0x10   :  { %v39_v13 = vrot.slane %v38_v11, 1 }
  0x11   :  { %v46_v14 = vrot.slane %v45_v12, 1 }
  0x12   :  { %v40_v16 = vadd.f32 %v39_v13, %v38_v11 }
  0x13   :  { %v47_v17 = vadd.f32 %v46_v14, %v45_v12 }
  0x15   :  { %v51_v18 = vsel %vm50_vm1, %v47_v17, %v40_v16 }
  0x16   :  { %v53_v19 = vadd.f32 %v51_v18, %v32_v15 }
  0x18   :  { %54 = vst [vmem:[#allocation2] sm:$0x3] %v53_v19 }
  0x1f   :  { %v58_v20 = vld [vmem:[#allocation2] sm:$0x3] }
  0x20   :  { %v59_v21 = vmul.f32 0.125, %v58_v20 }
  0x22   :  { %60 = vst [vmem:[#allocation6] sm:$0x3] %v59_v21 }
  0x23   :  { %71 = dma.vmem_to_hbm [thread:$0]  %s67_s13, 32, %s69_s16, [#allocation5]  }
  0x24   :  { %133 = dma.done.wait [#allocation5], 32  }
  0x25   :  { %134 = vsyncadd [#allocation5], 4294967264 }
  0x26   :  { %76 = vsyncpa [#allocation4], 1 }
  0x27   :  { %77 = vsyncpa [#allocation5], 1 }

</bundles_post_ra>
